<compile_context>
chip_gen: v7x
topology: tpu7x:2x2x1
jax: 0.10.0
libtpu: 0.0.40
codegen_flags: <defaults>
</compile_context>

<pallas_src>
import functools

import jax
import jax.numpy as jnp
from jax.experimental import pallas as pl
from jax.experimental.pallas import tpu as pltpu

EPS = 1e-5          # nn.LayerNorm default eps
NEG_SLOPE = 0.05    # F.leaky_relu negative_slope in forward()

IN_SIZE = 25
H1 = 128            # hidden1 (already lane-dense)
H2 = 64             # hidden2 (LayerNorm is over 64 -> must NOT be padded)
OUT_SIZE = 6
OUT_PAD = 128       # lane-dense output slab; only first OUT_SIZE lanes are real


def _round_up(x, m):
    return ((x + m - 1) // m) * m


def _layernorm(h, gamma, beta):
    # LayerNorm over the last axis, biased variance (matches PyTorch).
    mean = jnp.mean(h, axis=-1, keepdims=True)
    centered = h - mean
    var = jnp.mean(centered * centered, axis=-1, keepdims=True)
    inv = jax.lax.rsqrt(var + EPS)
    return centered * inv * gamma + beta


def _leaky_relu(h):
    # For 0 < slope < 1, max(h, slope*h) == leaky_relu(h): single VALU max.
    return jnp.maximum(h, NEG_SLOPE * h)


def mlp_kernel(x_ref, w1_ref, w2_ref, w3_ref, p_ref, o_ref):
    # x_ref: (tm, 25) f32 ; weights bf16 ; p_ref: (8, 128) f32 packed params.
    p = p_ref[...]
    b1 = p[0:1, :]            # (1, 128)
    g1 = p[1:2, :]
    be1 = p[2:3, :]
    b2 = p[3:4, :H2]          # (1, 64)
    g2 = p[4:5, :H2]
    be2 = p[5:6, :H2]
    b3 = p[6:7, :]            # (1, 128) (zero in padded lanes)

    # bf16 cast done in-kernel (no host-side pad/cast round trip).
    x = x_ref[...].astype(jnp.bfloat16)

    # fc1 -> ln1 -> leaky_relu   (dropout1 = identity)
    h = jnp.dot(x, w1_ref[...], preferred_element_type=jnp.float32) + b1
    h = _leaky_relu(_layernorm(h, g1, be1))

    # fc2 -> ln2 -> leaky_relu   (dropout2 = identity)
    h = jnp.dot(h.astype(jnp.bfloat16), w2_ref[...],
                preferred_element_type=jnp.float32) + b2
    h = _leaky_relu(_layernorm(h, g2, be2))

    # fc3 (output padded to 128 lanes -> unmasked lane-dense bf16 stores)
    out = jnp.dot(h.astype(jnp.bfloat16), w3_ref[...],
                  preferred_element_type=jnp.float32) + b3
    o_ref[...] = out.astype(o_ref.dtype)


def prepare_params(p):
    """Host-side, one-time: cast GEMM weights to bf16, zero-pad w3/b3 to 128
    output lanes, pack the 7 small per-channel vectors into one (8,128) f32."""
    in_size = p["w1"].shape[0]
    out_size = p["w3"].shape[1]

    w3 = jnp.zeros((H2, OUT_PAD), jnp.float32).at[:, :out_size].set(p["w3"])

    packed = jnp.zeros((8, 128), jnp.float32)
    packed = packed.at[0, :H1].set(p["b1"][0])
    packed = packed.at[1, :H1].set(p["g1"][0])
    packed = packed.at[2, :H1].set(p["be1"][0])
    packed = packed.at[3, :H2].set(p["b2"][0])
    packed = packed.at[4, :H2].set(p["g2"][0])
    packed = packed.at[5, :H2].set(p["be2"][0])
    packed = packed.at[6, :out_size].set(p["b3"][0])

    return {
        "w1": p["w1"].astype(jnp.bfloat16),        # (25, 128)
        "w2": p["w2"].astype(jnp.bfloat16),        # (128, 64)
        "w3": w3.astype(jnp.bfloat16),             # (64, 128), zero-padded cols
        "packed": packed,
        "in_size": in_size,
        "out_size": out_size,
    }


def _choose_tm(B, tm_max):
    """Batch tile: big enough to amortize the ~0.35us per-step overhead, but
    guaranteeing >=2 grid steps once the batch is big enough so the v7x
    megacore ("parallel" axis) actually gets both TensorCores busy."""
    b16 = _round_up(max(B, 1), 16)   # 16 keeps bf16 (16,128) sublane packing clean
    if b16 <= 32:
        return b16                   # tiny batch: single small step
    return min(tm_max, _round_up(pl.cdiv(b16, 2), 16))


@functools.partial(jax.jit, static_argnames=("out_size", "tm_max"))
def mlp_forward(x, w1, w2, w3, packed, *, out_size=OUT_SIZE, tm_max=1024):
    """x: (B, input_size) float32 (fed to the kernel as-is, no host padding)."""
    B, F = x.shape
    tm = _choose_tm(B, tm_max)
    grid = (pl.cdiv(B, tm),)   # partial last block is masked by Pallas

    out = pl.pallas_call(
        mlp_kernel,
        grid=grid,
        in_specs=[
            pl.BlockSpec((tm, F), lambda i: (i, 0)),        # x tile (f32, 25 wide)
            pl.BlockSpec((F, H1), lambda i: (0, 0)),        # w1 (VMEM-resident)
            pl.BlockSpec((H1, H2), lambda i: (0, 0)),       # w2 (resident)
            pl.BlockSpec((H2, OUT_PAD), lambda i: (0, 0)),  # w3 (resident)
            pl.BlockSpec((8, 128), lambda i: (0, 0)),       # packed params
        ],
        out_specs=pl.BlockSpec((tm, OUT_PAD), lambda i: (i, 0)),
        out_shape=jax.ShapeDtypeStruct((B, OUT_PAD), jnp.bfloat16),
        compiler_params=pltpu.CompilerParams(
            dimension_semantics=("parallel",)),
    )(x, w1, w2, w3, packed)

    # Slice the 6 real lanes and upcast; fused into this jit (no extra pass).
    return out[:, :out_size].astype(jnp.float32)


def init_params(key, input_size=IN_SIZE, hidden1=H1, hidden2=H2,
                output_size=OUT_SIZE):
    """Deterministic kaiming_normal_(nonlinearity='leaky_relu', a=0) init,
    zero bias, LayerNorm gamma=1 / beta=0 — mirrors MLP.init_weights()."""
    ks = jax.random.split(key, 3)

    def kaiming(k, fan_in, fan_out):
        gain = 2.0 ** 0.5                       # calculate_gain('leaky_relu', a=0)
        std = gain / (fan_in ** 0.5)
        # stored transposed: (in, out) so the kernel does x @ W
        return std * jax.random.normal(k, (fan_in, fan_out), dtype=jnp.float32)

    return {
        "w1": kaiming(ks[0], input_size, hidden1),
        "b1": jnp.zeros((1, hidden1), jnp.float32),
        "g1": jnp.ones((1, hidden1), jnp.float32),
        "be1": jnp.zeros((1, hidden1), jnp.float32),
        "w2": kaiming(ks[1], hidden1, hidden2),
        "b2": jnp.zeros((1, hidden2), jnp.float32),
        "g2": jnp.ones((1, hidden2), jnp.float32),
        "be2": jnp.zeros((1, hidden2), jnp.float32),
        "w3": kaiming(ks[2], hidden2, output_size),
        "b3": jnp.zeros((1, output_size), jnp.float32),
    }


def mlp_reference(x, p):
    """Pure f32 JAX reference (PyTorch-equivalent forward, eval mode)."""
    h = x @ p["w1"] + p["b1"]
    h = _leaky_relu(_layernorm(h, p["g1"], p["be1"]))
    h = h @ p["w2"] + p["b2"]
    h = _leaky_relu(_layernorm(h, p["g2"], p["be2"]))
    return h @ p["w3"] + p["b3"]


if __name__ == "__main__":
    key = jax.random.PRNGKey(0)
    k_param, k_x = jax.random.split(key)

    B = 64
    params = init_params(k_param)
    prep = prepare_params(params)
    x = jax.random.normal(k_x, (B, IN_SIZE), dtype=jnp.float32)

    # B=64 -> tm=32, 2 grid steps: exercises the batch pipeline / megacore path.
    out = mlp_forward(x, prep["w1"], prep["w2"], prep["w3"], prep["packed"],
                      out_size=OUT_SIZE)
    out = jax.block_until_ready(out)

    ref = mlp_reference(x, params)
    assert out.shape == (B, OUT_SIZE)
    # GEMMs in bf16 (f32 accumulate) + bf16 output store -> bf16-level tolerance.
    assert jnp.allclose(out, ref, atol=5e-2, rtol=5e-2), "mismatch vs JAX reference"

    # Second shape (B=50): exercises the partial last block (masked writeback).
    x2 = jax.random.normal(jax.random.PRNGKey(1), (50, IN_SIZE), dtype=jnp.float32)
    out2 = jax.block_until_ready(
        mlp_forward(x2, prep["w1"], prep["w2"], prep["w3"], prep["packed"],
                    out_size=OUT_SIZE))
    ref2 = mlp_reference(x2, params)
    assert out2.shape == (50, OUT_SIZE)
    assert jnp.allclose(out2, ref2, atol=5e-2, rtol=5e-2), "mismatch (partial block)"

    print("KERNEL_OK")
</pallas_src>

<mosaic_0001>
module attributes {stable_mosaic.version = 11 : i64} {
  func.func @mlp_kernel(%arg0: i32, %arg1: memref<32x25xf32, #tpu.memory_space<vmem>>, %arg2: memref<25x128xbf16, #tpu.memory_space<vmem>>, %arg3: memref<128x64xbf16, #tpu.memory_space<vmem>>, %arg4: memref<64x128xbf16, #tpu.memory_space<vmem>>, %arg5: memref<8x128xf32, #tpu.memory_space<vmem>>, %arg6: memref<32x128xbf16, #tpu.memory_space<vmem>>) attributes {dimension_semantics = [#tpu.dimension_semantics<parallel>], iteration_bounds = array<i64: 2>, scalar_prefetch = 0 : i64, scratch_operands = 0 : i64, tpu.core_type = #tpu.core_type<tc>, window_params = [{transform_indices = @transform_0, window_bounds = array<i64: 32, 25>}, {pipeline_mode = #tpu.pipeline_mode<synchronous>, transform_indices = @transform_1, window_bounds = array<i64: 25, 128>}, {pipeline_mode = #tpu.pipeline_mode<synchronous>, transform_indices = @transform_2, window_bounds = array<i64: 128, 64>}, {pipeline_mode = #tpu.pipeline_mode<synchronous>, transform_indices = @transform_3, window_bounds = array<i64: 64, 128>}, {pipeline_mode = #tpu.pipeline_mode<synchronous>, transform_indices = @transform_4, window_bounds = array<i64: 8, 128>}, {transform_indices = @transform_5, window_bounds = array<i64: 32, 128>}]} {
    %c0 = arith.constant 0 : index
    %c0_0 = arith.constant 0 : index
    %0 = vector.load %arg5[%c0, %c0_0] : memref<8x128xf32, #tpu.memory_space<vmem>>, vector<8x128xf32>
    %1 = vector.extract_strided_slice %0 {offsets = [0, 0], sizes = [1, 128], strides = [1, 1]} : vector<8x128xf32> to vector<1x128xf32>
    %2 = vector.extract_strided_slice %0 {offsets = [1, 0], sizes = [1, 128], strides = [1, 1]} : vector<8x128xf32> to vector<1x128xf32>
    %3 = vector.extract_strided_slice %0 {offsets = [2, 0], sizes = [1, 128], strides = [1, 1]} : vector<8x128xf32> to vector<1x128xf32>
    %4 = vector.extract_strided_slice %0 {offsets = [3, 0], sizes = [1, 64], strides = [1, 1]} : vector<8x128xf32> to vector<1x64xf32>
    %5 = vector.extract_strided_slice %0 {offsets = [4, 0], sizes = [1, 64], strides = [1, 1]} : vector<8x128xf32> to vector<1x64xf32>
    %6 = vector.extract_strided_slice %0 {offsets = [5, 0], sizes = [1, 64], strides = [1, 1]} : vector<8x128xf32> to vector<1x64xf32>
    %7 = vector.extract_strided_slice %0 {offsets = [6, 0], sizes = [1, 128], strides = [1, 1]} : vector<8x128xf32> to vector<1x128xf32>
    %c0_1 = arith.constant 0 : index
    %c0_2 = arith.constant 0 : index
    %8 = vector.load %arg1[%c0_1, %c0_2] : memref<32x25xf32, #tpu.memory_space<vmem>>, vector<32x25xf32>
    %9 = arith.truncf %8 : vector<32x25xf32> to vector<32x25xbf16>
    %c0_3 = arith.constant 0 : index
    %c0_4 = arith.constant 0 : index
    %10 = vector.load %arg2[%c0_3, %c0_4] : memref<25x128xbf16, #tpu.memory_space<vmem>>, vector<25x128xbf16>
    %cst = arith.constant dense<0.000000e+00> : vector<32x128xf32>
    %11 = tpu.matmul %9, %10, %cst {dimension_numbers = #tpu.dot_dimension_numbers<[1], [0], [0], [1], [0, 0, 1, 1], [], []>} : vector<32x25xbf16>, vector<25x128xbf16>, vector<32x128xf32> -> vector<32x128xf32>
    %12 = vector.broadcast %1 : vector<1x128xf32> to vector<32x128xf32>
    %13 = arith.addf %11, %12 : vector<32x128xf32>
    %cst_5 = arith.constant dense<0.000000e+00> : vector<32xf32>
    %14 = vector.multi_reduction <add>, %13, %cst_5 [1] : vector<32x128xf32> to vector<32xf32>
    %15 = vector.shape_cast %14 : vector<32xf32> to vector<32x1xf32>
    %cst_6 = arith.constant 1.280000e+02 : f32
    %16 = vector.broadcast %cst_6 : f32 to vector<32x1xf32>
    %17 = arith.divf %15, %16 : vector<32x1xf32>
    %18 = vector.broadcast %17 : vector<32x1xf32> to vector<32x128xf32>
    %19 = arith.subf %13, %18 : vector<32x128xf32>
    %20 = arith.mulf %19, %19 : vector<32x128xf32>
    %cst_7 = arith.constant dense<0.000000e+00> : vector<32xf32>
    %21 = vector.multi_reduction <add>, %20, %cst_7 [1] : vector<32x128xf32> to vector<32xf32>
    %22 = vector.shape_cast %21 : vector<32xf32> to vector<32x1xf32>
    %cst_8 = arith.constant 1.280000e+02 : f32
    %23 = vector.broadcast %cst_8 : f32 to vector<32x1xf32>
    %24 = arith.divf %22, %23 : vector<32x1xf32>
    %cst_9 = arith.constant 9.99999974E-6 : f32
    %25 = vector.broadcast %cst_9 : f32 to vector<32x1xf32>
    %26 = arith.addf %24, %25 : vector<32x1xf32>
    %27 = math.rsqrt %26 : vector<32x1xf32>
    %28 = vector.broadcast %27 : vector<32x1xf32> to vector<32x128xf32>
    %29 = arith.mulf %19, %28 : vector<32x128xf32>
    %30 = vector.broadcast %2 : vector<1x128xf32> to vector<32x128xf32>
    %31 = arith.mulf %29, %30 : vector<32x128xf32>
    %32 = vector.broadcast %3 : vector<1x128xf32> to vector<32x128xf32>
    %33 = arith.addf %31, %32 : vector<32x128xf32>
    %cst_10 = arith.constant 5.000000e-02 : f32
    %34 = vector.broadcast %cst_10 : f32 to vector<32x128xf32>
    %35 = arith.mulf %34, %33 : vector<32x128xf32>
    %36 = arith.maximumf %33, %35 : vector<32x128xf32>
    %37 = arith.truncf %36 : vector<32x128xf32> to vector<32x128xbf16>
    %c0_11 = arith.constant 0 : index
    %c0_12 = arith.constant 0 : index
    %38 = vector.load %arg3[%c0_11, %c0_12] : memref<128x64xbf16, #tpu.memory_space<vmem>>, vector<128x64xbf16>
    %cst_13 = arith.constant dense<0.000000e+00> : vector<32x64xf32>
    %39 = tpu.matmul %37, %38, %cst_13 {dimension_numbers = #tpu.dot_dimension_numbers<[1], [0], [0], [1], [0, 0, 1, 1], [], []>} : vector<32x128xbf16>, vector<128x64xbf16>, vector<32x64xf32> -> vector<32x64xf32>
    %40 = vector.broadcast %4 : vector<1x64xf32> to vector<32x64xf32>
    %41 = arith.addf %39, %40 : vector<32x64xf32>
    %cst_14 = arith.constant dense<0.000000e+00> : vector<32xf32>
    %42 = vector.multi_reduction <add>, %41, %cst_14 [1] : vector<32x64xf32> to vector<32xf32>
    %43 = vector.shape_cast %42 : vector<32xf32> to vector<32x1xf32>
    %cst_15 = arith.constant 6.400000e+01 : f32
    %44 = vector.broadcast %cst_15 : f32 to vector<32x1xf32>
    %45 = arith.divf %43, %44 : vector<32x1xf32>
    %46 = vector.broadcast %45 : vector<32x1xf32> to vector<32x64xf32>
    %47 = arith.subf %41, %46 : vector<32x64xf32>
    %48 = arith.mulf %47, %47 : vector<32x64xf32>
    %cst_16 = arith.constant dense<0.000000e+00> : vector<32xf32>
    %49 = vector.multi_reduction <add>, %48, %cst_16 [1] : vector<32x64xf32> to vector<32xf32>
    %50 = vector.shape_cast %49 : vector<32xf32> to vector<32x1xf32>
    %cst_17 = arith.constant 6.400000e+01 : f32
    %51 = vector.broadcast %cst_17 : f32 to vector<32x1xf32>
    %52 = arith.divf %50, %51 : vector<32x1xf32>
    %cst_18 = arith.constant 9.99999974E-6 : f32
    %53 = vector.broadcast %cst_18 : f32 to vector<32x1xf32>
    %54 = arith.addf %52, %53 : vector<32x1xf32>
    %55 = math.rsqrt %54 : vector<32x1xf32>
    %56 = vector.broadcast %55 : vector<32x1xf32> to vector<32x64xf32>
    %57 = arith.mulf %47, %56 : vector<32x64xf32>
    %58 = vector.broadcast %5 : vector<1x64xf32> to vector<32x64xf32>
    %59 = arith.mulf %57, %58 : vector<32x64xf32>
    %60 = vector.broadcast %6 : vector<1x64xf32> to vector<32x64xf32>
    %61 = arith.addf %59, %60 : vector<32x64xf32>
    %cst_19 = arith.constant 5.000000e-02 : f32
    %62 = vector.broadcast %cst_19 : f32 to vector<32x64xf32>
    %63 = arith.mulf %62, %61 : vector<32x64xf32>
    %64 = arith.maximumf %61, %63 : vector<32x64xf32>
    %65 = arith.truncf %64 : vector<32x64xf32> to vector<32x64xbf16>
    %c0_20 = arith.constant 0 : index
    %c0_21 = arith.constant 0 : index
    %66 = vector.load %arg4[%c0_20, %c0_21] : memref<64x128xbf16, #tpu.memory_space<vmem>>, vector<64x128xbf16>
    %cst_22 = arith.constant dense<0.000000e+00> : vector<32x128xf32>
    %67 = tpu.matmul %65, %66, %cst_22 {dimension_numbers = #tpu.dot_dimension_numbers<[1], [0], [0], [1], [0, 0, 1, 1], [], []>} : vector<32x64xbf16>, vector<64x128xbf16>, vector<32x128xf32> -> vector<32x128xf32>
    %68 = vector.broadcast %7 : vector<1x128xf32> to vector<32x128xf32>
    %69 = arith.addf %67, %68 : vector<32x128xf32>
    %70 = arith.truncf %69 : vector<32x128xf32> to vector<32x128xbf16>
    %c0_23 = arith.constant 0 : index
    %c0_24 = arith.constant 0 : index
    %71 = vector.load %arg6[%c0_23, %c0_24] : memref<32x128xbf16, #tpu.memory_space<vmem>>, vector<32x128xbf16>
    tpu.vector_store %arg6[%c0_23, %c0_24], %70 {strides = array<i32>} : memref<32x128xbf16, #tpu.memory_space<vmem>>, vector<32x128xbf16>,
    return
  }
  func.func @transform_0(%arg0: i32) -> (i32, i32) {
    %c0_i32 = arith.constant 0 : i32
    %c0_i32_0 = arith.constant 0 : i32
    return %arg0, %c0_i32 : i32, i32
  }
  func.func @transform_1(%arg0: i32) -> (i32, i32) {
    %c0_i32 = arith.constant 0 : i32
    %c0_i32_0 = arith.constant 0 : i32
    %c0_i32_1 = arith.constant 0 : i32
    return %c0_i32, %c0_i32_0 : i32, i32
  }
  func.func @transform_2(%arg0: i32) -> (i32, i32) {
    %c0_i32 = arith.constant 0 : i32
    %c0_i32_0 = arith.constant 0 : i32
    %c0_i32_1 = arith.constant 0 : i32
    return %c0_i32, %c0_i32_0 : i32, i32
  }
  func.func @transform_3(%arg0: i32) -> (i32, i32) {
    %c0_i32 = arith.constant 0 : i32
    %c0_i32_0 = arith.constant 0 : i32
    %c0_i32_1 = arith.constant 0 : i32
    return %c0_i32, %c0_i32_0 : i32, i32
  }
  func.func @transform_4(%arg0: i32) -> (i32, i32) {
    %c0_i32 = arith.constant 0 : i32
    %c0_i32_0 = arith.constant 0 : i32
    %c0_i32_1 = arith.constant 0 : i32
    return %c0_i32, %c0_i32_0 : i32, i32
  }
  func.func @transform_5(%arg0: i32) -> (i32, i32) {
    %c0_i32 = arith.constant 0 : i32
    %c0_i32_0 = arith.constant 0 : i32
    return %arg0, %c0_i32 : i32, i32
  }
}

</mosaic_0001>

<bundles_post_ra>
// kernel: mlp_forward.1
= control target key start
LH: loop header
LB: loop body
LE: loop exit
PB: predicated region body
PF: predicated region fallthrough
CT: control target
= control target key end

     0   :  { %s939_s18 = smov 0   ;;  %s1043_s0 = inlined_call_operand.vmem [shape: f32[64,25], index: 0, kind: input, shape index: {}]   ;;  %s1044_s1 = inlined_call_operand.vmem [shape: bf16[25,128], index: 1, kind: input, shape index: {}]   ;;  %s1045_s2 = inlined_call_operand.vmem [shape: bf16[128,64], index: 2, kind: input, shape index: {}]   ;;  %s1046_s3 = inlined_call_operand.vmem [shape: bf16[64,128], index: 3, kind: input, shape index: {}]   ;;  %s1047_s4 = inlined_call_operand.vmem [shape: f32[8,128], index: 4, kind: input, shape index: {}]   ;;  %s1048_s5 = inlined_call_operand.vmem [shape: bf16[64,128], index: 5, kind: output, shape index: {}]  }
   0x1 LB: > { %s753_s19 = sadd.s32 4294967295, %s906_s18   ;;  %p757_p0 = scmp.ge.s32.totalorder %s906_s18, 1  ;;  %s906_s18 = sphi %s939_s18, %s15_s18  }
   0x2   : > { %p188_p1 = scmp.lt.s32.totalorder %s906_s18, 3 }
   0x4   : > { %p189_p2 = pnand %p757_p0, %p188_p1 }
   0x5   : > { %v870_v0 = vld [vmem:[%s1044_s1] sm:$0xff] (!%p189_p2)   ;;  %vm262_vm0 = vcmask (!%p189_p2), 1043456   ;;  %v871_v1 = vld [vmem:[%s1044_s1 + $0x8] sm:$0x1f] (!%p189_p2)   ;;  %vm263_vm1 = vcmask (!%p189_p2), 1044480   ;;  %s758_s24 = sshll.u32 (!%p189_p2), %s753_s19, 2  ;;  %v240_v12 = vlaneseq (!%p189_p2) }
   0x6   : > { %192 = sbr.rel (%p189_p2) target bundleno = 1320 (0x528), region = 40  ;;  %821 = vmatprep.subr.bf16.mxu0 (!%p189_p2), %v870_v0  ;;  %v908_v2 = vmov (!%p189_p2), 65535   ;;  %p217_p3 = scmp.lt.s32.totalorder (!%p189_p2), %s758_s24, 7  ;;  %vm255_vm2 = vcmask (!%p189_p2), 203776   ;;  %v965_v15 = vld [vmem:[%s1047_s4] sm:$0xff] (!%p189_p2)  ;;  %v873_v42 = vld [vmem:[%s1045_s2 + $0x8] sm:$0xff] (!%p189_p2)  }
   0x7   : > { %822 = vmatpush3.bf16.msra.mxu0 (!%p189_p2), %v870_v0  ;;  %v264_v3 = vsel (!%p189_p2), %vm262_vm0, 4294967295, %v908_v2  ;;  %v959_v13 = vshrl.u32 (!%p189_p2), %v240_v12, 7  ;;  %v872_v41 = vld [vmem:[%s1045_s2] sm:$0xff] (!%p189_p2)   ;;  %v874_v43 = vld [vmem:[%s1045_s2 + $0x10] sm:$0xff] (!%p189_p2)   ;;  %v875_v44 = vld [vmem:[%s1045_s2 + $0x18] sm:$0xff] (!%p189_p2)   ;;  %vm506_vm3 = vcmask (!%p189_p2), 523264  }
   0x8   : > { %v265_v4 = vsel (!%p189_p2), %vm263_vm1, %v264_v3, 0  ;;  %829 = vmatprep.subr.bf16.mxu1 (!%p189_p2), %v872_v41  ;;  %v876_v45 = vld [vmem:[%s1045_s2 + $0x20] sm:$0xff] (!%p189_p2)   ;;  %v877_v46 = vld [vmem:[%s1045_s2 + $0x28] sm:$0xff] (!%p189_p2)   ;;  %v878_v47 = vld [vmem:[%s1045_s2 + $0x30] sm:$0xff] (!%p189_p2)  }
   0x9   : > { %v267_v5 = vand.u32 (!%p189_p2), %v871_v1, %v265_v4  ;;  %v242_v14 = vsub.s32 (!%p189_p2), 0, %v959_v13  ;;  %830 = vmatpush3.bf16.msra.mxu1 (!%p189_p2), %v872_v41  ;;  %v879_v48 = vld [vmem:[%s1045_s2 + $0x38] sm:$0xff] (!%p189_p2)   ;;  %v365_v60 = vsub.s32 (!%p189_p2), 1, %v959_v13  ;;  %v373_v62 = vsub.s32 (!%p189_p2), 2, %v959_v13 }
   0xa   : > { %831 = vmatprep.subr.bf16.mxu1 (!%p189_p2), %v873_v42 }
   0xb   : > { %823 = vmatprep.subr.bf16.mxu0 (!%p189_p2), %v267_v5  ;;  %v243_v16 = vrot.slane (!%p189_p2), %v965_v15, %v242_v14  ;;  %v366_v63 = vrot.slane (!%p189_p2), %v965_v15, %v365_v60  ;;  %v374_v2 = vrot.slane (!%p189_p2), %v965_v15, %v373_v62 }
   0xc   : > { %824 = vmatpush3.bf16.msra.mxu0 (!%p189_p2), %v267_v5 }
   0xd   : > { %s1050_s24 = smov (!%p217_p3, %s758_s24), 7  ;;  %832 = vmatpush3.bf16.msra.mxu1 %v873_v42 }
   0xe   : > { %s759_s25 = sshll.u32 %s1050_s24, 3  ;;  %833 = vmatprep.subr.bf16.mxu1 %v874_v43  ;;  %s761_s7 = sshll.u32 %s1050_s24, 2 }
   0xf   : > { %s220_s28 = scalar_lea.vmem %s1043_s0, %s759_s25  ;;  %s226_s10 = scalar_lea.vmem %s1048_s5, %s761_s7 }
  0x10   : > { %v230_v6 = vld [vmem:[%s220_s28] sm:$0xff]  ;;  %v231_v7 = vld [vmem:[%s220_s28 + $0x8] sm:$0xff]  ;;  %v232_v8 = vld [vmem:[%s220_s28 + $0x10] sm:$0xff] }
  0x11   : > { %v234_v9 = vpack.c.bf16 %v231_v7, %v230_v6  ;;  %v233_v10 = vld [vmem:[%s220_s28 + $0x18] sm:$0xff]  ;;  %834 = vmatpush3.bf16.msra.mxu1 %v874_v43 }
  0x12   : > { %v235_v11 = vpack.c.bf16 %v233_v10, %v232_v8  ;;  %835 = vmatprep.subr.bf16.mxu1 %v875_v44 }
  0x13   : > { %825 = vmatprep.mubr.msk.bf16.mxu0 %vm255_vm2, %v234_v9 }
  0x14   : > { %826 = vmatmul.mubr.msk.bf16.vlgmr.msra.gmra.mrb[0].mxu0 %vm255_vm2, %v235_v11 }
  0x15   : > { %836 = vmatpush3.bf16.msra.mxu1 %v875_v44 }
  0x16   : > { %837 = vmatprep.subr.bf16.mxu1 %v876_v45 }
  0x19   : > { %838 = vmatpush3.bf16.msra.mxu1 %v876_v45 }
  0x1a   : > { %839 = vmatprep.subr.bf16.mxu1 %v877_v46 }
  0x1d   : > { %840 = vmatpush3.bf16.msra.mxu1 %v877_v46 }
  0x1e   : > { %841 = vmatprep.subr.bf16.mxu1 %v878_v47 }
  0x21   : > { %842 = vmatpush3.bf16.msra.mxu1 %v878_v47 }
  0x22   : > { %843 = vmatprep.subr.bf16.mxu1 %v879_v48 }
  0x25   : > { %844 = vmatpush3.bf16.msra.mxu1 %v879_v48 }
  0xe7   : > { %v827_v17 = vpop.f32.mrb[0].mxu0 }
  0xe8   : > { %v312_v18 = vadd.f32 %v827_v17, %v243_v16  ;;  %v303_v19 = vpop.f32.mrb[1].mxu0 }
  0xe9   : > { %v304_v20 = vadd.f32 %v303_v19, %v243_v16  ;;  %v828_v21 = vpop.f32.mrb[2].mxu0 }
  0xea   : > { %322 = vadd.xlane.f32.xlu1 %v312_v18  ;;  %v306_v22 = vpop.f32.mrb[3].mxu0  ;;  %v315_v23 = vadd.f32 %v828_v21, %v243_v16 }
  0xeb   : > { %318 = vadd.xlane.f32.xlu0 %v304_v20  ;;  %v307_v24 = vadd.f32 %v306_v22, %v243_v16 }
  0xee   : > { %324 = vadd.xlane.f32.xlu1 %v315_v23 }
  0xef   : > { %320 = vadd.xlane.f32.xlu0 %v307_v24 }
 0x177   : > { %v323_v25 = vpop.xlane.xlu1 %322 }
 0x178   : > { %v319_v26 = vpop.xlane.xlu0 %318  ;;  %v329_v27 = vmul.f32 0.0078125, %v323_v25 }
 0x179   : > { %v327_v28 = vmul.f32 0.0078125, %v319_v26 }
 0x17a   : > { %v968_v32 = vsub.f32 %v312_v18, %v329_v27 }
 0x17b   : > { %v331_v29 = vsub.f32 %v304_v20, %v327_v28  ;;  %v325_v30 = vpop.xlane.xlu1 %324 }
 0x17c   : > { %v321_v31 = vpop.xlane.xlu0 %320  ;;  %v330_v33 = vmul.f32 0.0078125, %v325_v30  ;;  %v337_v38 = vmul.f32 %v968_v32, %v968_v32 }
 0x17d   : > { %v328_v34 = vmul.f32 0.0078125, %v321_v31  ;;  %v335_v35 = vmul.f32 %v331_v29, %v331_v29 }
 0x17e   : > { %v970_v37 = vsub.f32 %v315_v23, %v330_v33 }
 0x17f   : > { %v332_v36 = vsub.f32 %v307_v24, %v328_v34  ;;  %339 = vadd.xlane.f32.xlu0 %v335_v35 }
 0x180   : > { %v338_v40 = vmul.f32 %v970_v37, %v970_v37 }
 0x181   : > { %v336_v39 = vmul.f32 %v332_v36, %v332_v36 }
 0x183   : > { %343 = vadd.xlane.f32.xlu0 %v337_v38  ;;  %341 = vadd.xlane.f32.xlu1 %v336_v39 }
 0x187   : > { %345 = vadd.xlane.f32.xlu1 %v338_v40 }
 0x20c   : > { %v340_v49 = vpop.xlane.xlu0 %339 }
 0x20d   : > { %v347_v50 = vmul.f32 0.0078125, %v340_v49 }
 0x20f   : > { %v351_v51 = vadd.f32 1e-05, %v347_v50 }
 0x210   : > { %v342_v52 = vpop.xlane.xlu1 %341  ;;  %v344_v53 = vpop.xlane.xlu0 %343 }
 0x211   : > { %884 = vrsqrt.f32 %v351_v51  ;;  %v348_v54 = vmul.f32 0.0078125, %v342_v52  ;;  %v349_v55 = vmul.f32 0.0078125, %v344_v53 }
 0x213   : > { %v352_v56 = vadd.f32 1e-05, %v348_v54  ;;  %v353_v57 = vadd.f32 1e-05, %v349_v55 }
 0x214   : > { %v346_v58 = vpop.xlane.xlu1 %345 }
 0x215   : > { %886 = vrsqrt.f32 %v352_v56  ;;  %v350_v59 = vmul.f32 0.0078125, %v346_v58 }
 0x216   : > { %888 = vrsqrt.f32 %v353_v57 }
 0x217   : > { %v354_v61 = vadd.f32 1e-05, %v350_v59 }
 0x219   : > { %890 = vrsqrt.f32 %v354_v61 }
 0x21b   : > { %v885_v0 = vpop.eup %884 }
 0x21c   : > { %v359_v1 = vmul.f32 %v885_v0, %v331_v29  ;;  %v407_v29 = vsub.s32 3, %v959_v13  ;;  %v881_v0 = vld [vmem:[%s1046_s3 + $0x8] sm:$0xff]  }
 0x21e   : > { %v367_v3 = vmul.f32 %v366_v63, %v359_v1  ;;  %v408_v30 = vrot.slane %v965_v15, %v407_v29  ;;  %v882_v1 = vld [vmem:[%s1046_s3 + $0x10] sm:$0xff]  }
 0x21f   : > { %v887_v4 = vpop.eup %886 }
 0x220   : > { %v889_v5 = vpop.eup %888  ;;  %v360_v6 = vmul.f32 %v887_v4, %v332_v36  ;;  %v375_v7 = vadd.f32 %v374_v2, %v367_v3 }
 0x221   : > { %v361_v8 = vmul.f32 %v889_v5, %v968_v32 }
 0x222   : > { %v368_v9 = vmul.f32 %v366_v63, %v360_v6  ;;  %v379_v14 = vmul.f32 0.05, %v375_v7 }
 0x223   : > { %v891_v10 = vpop.eup %890  ;;  %v369_v11 = vmul.f32 %v366_v63, %v361_v8 }
 0x224   : > { %v376_v12 = vadd.f32 %v374_v2, %v368_v9  ;;  %v362_v16 = vmul.f32 %v891_v10, %v970_v37  ;;  %v383_v20 = vmax.f32 %v375_v7, %v379_v14 }
 0x225   : > { %v377_v17 = vadd.f32 %v374_v2, %v369_v11 }
 0x226   : > { %v380_v18 = vmul.f32 0.05, %v376_v12  ;;  %v370_v19 = vmul.f32 %v366_v63, %v362_v16  ;;  %v880_v63 = vld [vmem:[%s1046_s3] sm:$0xff]  }
 0x227   : > { %v381_v23 = vmul.f32 0.05, %v377_v17  ;;  %849 = vmatprep.subr.bf16.mxu0 %v880_v63 }
 0x228   : > { %v384_v21 = vmax.f32 %v376_v12, %v380_v18  ;;  %v378_v22 = vadd.f32 %v374_v2, %v370_v19  ;;  %850 = vmatpush3.bf16.msra.mxu0 %v880_v63  ;;  %v883_v2 = vld [vmem:[%s1046_s3 + $0x18] sm:$0xff]   ;;  %v570_v18 = vsub.s32 5, %v959_v13 }
 0x229   : > { %v385_v26 = vmax.f32 %v377_v17, %v381_v23  ;;  %851 = vmatprep.subr.bf16.mxu0 %v881_v0  ;;  %v562_v17 = vsub.s32 4, %v959_v13 }
 0x22a   : > { %v387_v24 = vpack.c.bf16 %v384_v21, %v383_v20  ;;  %v382_v25 = vmul.f32 0.05, %v378_v22 }
 0x22b   : > { %v563_v19 = vrot.slane %v965_v15, %v562_v17 }
 0x22c   : > { %845 = vmatprep.mubr.bf16.mxu1 %v387_v24  ;;  %v386_v27 = vmax.f32 %v378_v22, %v382_v25  ;;  %852 = vmatpush3.bf16.msra.mxu0 %v881_v0  ;;  %v571_v22 = vrot.slane %v965_v15, %v570_v18 }
 0x22d   : > { %853 = vmatprep.subr.bf16.mxu0 %v882_v1 }
 0x22e   : > { %v388_v28 = vpack.c.bf16 %v386_v27, %v385_v26 }
 0x230   : > { %846 = vmatmul.mubr.bf16.vlgmr.msra.gmra.mrb[0].mxu1 %v388_v28  ;;  %854 = vmatpush3.bf16.msra.mxu0 %v882_v1 }
 0x231   : > { %855 = vmatprep.subr.bf16.mxu0 %v883_v2 }
 0x234   : > { %856 = vmatpush3.bf16.msra.mxu0 %v883_v2 }
 0x303   : > { %v847_v31 = vpop.f32.mrb[0].mxu1 }
 0x304   : > { %v491_v32 = vpop.f32.mrb[1].mxu1  ;;  %v500_v36 = vadd.f32 %v847_v31, %v408_v30 }
 0x305   : > { %v492_v33 = vadd.f32 %v491_v32, %v408_v30  ;;  %v848_v34 = vpop.f32.mrb[2].mxu1 }
 0x306   : > { %v494_v35 = vpop.f32.mrb[3].mxu1  ;;  %v503_v39 = vadd.f32 %v848_v34, %v408_v30  ;;  %v513_v41 = vsel %vm506_vm3, %v500_v36, 0.0 }
 0x307   : > { %v495_v37 = vadd.f32 %v494_v35, %v408_v30  ;;  %v507_v38 = vsel %vm506_vm3, %v492_v33, 0.0 }
 0x308   : > { %508 = vadd.xlane.f32.xlu0 %v507_v38  ;;  %v516_v42 = vsel %vm506_vm3, %v503_v39, 0.0 }
 0x309   : > { %v510_v40 = vsel %vm506_vm3, %v495_v37, 0.0 }
 0x30a   : > { %511 = vadd.xlane.f32.xlu1 %v510_v40 }
 0x30c   : > { %514 = vadd.xlane.f32.xlu0 %v513_v41 }
 0x30e   : > { %517 = vadd.xlane.f32.xlu1 %v516_v42 }
 0x395   : > { %v509_v43 = vpop.xlane.xlu0 %508 }
 0x396   : > { %v520_v44 = vmul.f32 0.015625, %v509_v43 }
 0x397   : > { %v512_v45 = vpop.xlane.xlu1 %511 }
 0x398   : > { %v524_v46 = vsub.f32 %v492_v33, %v520_v44  ;;  %v521_v47 = vmul.f32 0.015625, %v512_v45 }
 0x399   : > { %v515_v48 = vpop.xlane.xlu0 %514 }
 0x39a   : > { %v525_v49 = vsub.f32 %v495_v37, %v521_v47  ;;  %v522_v50 = vmul.f32 0.015625, %v515_v48  ;;  %v528_v51 = vmul.f32 %v524_v46, %v524_v46  ;;  %v596_v47 = vsub.s32 6, %v959_v13 }
 0x39b   : > { %v518_v52 = vpop.xlane.xlu1 %517 }
 0x39c   : > { %v526_v53 = vsub.f32 %v500_v36, %v522_v50  ;;  %v523_v54 = vmul.f32 0.015625, %v518_v52  ;;  %v532_v55 = vsel %vm506_vm3, %v528_v51, 0.0  ;;  %v529_v56 = vmul.f32 %v525_v49, %v525_v49 }
 0x39d   : > { %533 = vadd.xlane.f32.xlu0 %v532_v55  ;;  %v597_v48 = vrot.slane %v965_v15, %v596_v47 }
 0x39e   : > { %v527_v57 = vsub.f32 %v503_v39, %v523_v54  ;;  %v535_v58 = vsel %vm506_vm3, %v529_v56, 0.0  ;;  %v530_v59 = vmul.f32 %v526_v53, %v526_v53 }
 0x39f   : > { %536 = vadd.xlane.f32.xlu1 %v535_v58 }
 0x3a0   : > { %v538_v60 = vsel %vm506_vm3, %v530_v59, 0.0  ;;  %v531_v61 = vmul.f32 %v527_v57, %v527_v57 }
 0x3a1   : > { %539 = vadd.xlane.f32.xlu0 %v538_v60 }
 0x3a2   : > { %v541_v62 = vsel %vm506_vm3, %v531_v61, 0.0 }
 0x3a3   : > { %542 = vadd.xlane.f32.xlu1 %v541_v62 }
 0x42a   : > { %v534_v3 = vpop.xlane.xlu0 %533 }
 0x42b   : > { %v544_v4 = vmul.f32 0.015625, %v534_v3 }
 0x42c   : > { %v537_v5 = vpop.xlane.xlu1 %536 }
 0x42d   : > { %v548_v6 = vadd.f32 1e-05, %v544_v4  ;;  %v545_v7 = vmul.f32 0.015625, %v537_v5 }
 0x42e   : > { %v540_v8 = vpop.xlane.xlu0 %539 }
 0x42f   : > { %892 = vrsqrt.f32 %v548_v6  ;;  %v549_v9 = vadd.f32 1e-05, %v545_v7  ;;  %v546_v10 = vmul.f32 0.015625, %v540_v8 }
 0x430   : > { %v543_v11 = vpop.xlane.xlu1 %542 }
 0x431   : > { %894 = vrsqrt.f32 %v549_v9  ;;  %v550_v12 = vadd.f32 1e-05, %v546_v10  ;;  %v547_v14 = vmul.f32 0.015625, %v543_v11 }
 0x433   : > { %896 = vrsqrt.f32 %v550_v12  ;;  %v551_v16 = vadd.f32 1e-05, %v547_v14 }
 0x435   : > { %898 = vrsqrt.f32 %v551_v16 }
 0x439   : > { %v893_v20 = vpop.eup %892 }
 0x43a   : > { %v556_v21 = vmul.f32 %v893_v20, %v524_v46 }
 0x43b   : > { %v895_v23 = vpop.eup %894 }
 0x43c   : > { %v557_v24 = vmul.f32 %v895_v23, %v525_v49  ;;  %v564_v25 = vmul.f32 %v563_v19, %v556_v21 }
 0x43d   : > { %v897_v26 = vpop.eup %896 }
 0x43e   : > { %v558_v27 = vmul.f32 %v897_v26, %v526_v53  ;;  %v565_v28 = vmul.f32 %v563_v19, %v557_v24  ;;  %v572_v29 = vadd.f32 %v571_v22, %v564_v25 }
 0x43f   : > { %v899_v30 = vpop.eup %898 }
 0x440   : > { %v566_v31 = vmul.f32 %v563_v19, %v558_v27  ;;  %v559_v32 = vmul.f32 %v899_v30, %v527_v57  ;;  %v573_v33 = vadd.f32 %v571_v22, %v565_v28  ;;  %v576_v34 = vmul.f32 0.05, %v572_v29 }
 0x442   : > { %v574_v35 = vadd.f32 %v571_v22, %v566_v31  ;;  %v567_v36 = vmul.f32 %v563_v19, %v559_v32  ;;  %v577_v37 = vmul.f32 0.05, %v573_v33  ;;  %v580_v39 = vmax.f32 %v572_v29, %v576_v34 }
 0x444   : > { %v575_v38 = vadd.f32 %v571_v22, %v567_v36  ;;  %v581_v40 = vmax.f32 %v573_v33, %v577_v37  ;;  %v578_v41 = vmul.f32 0.05, %v574_v35 }
 0x446   : > { %v584_v42 = vpack.c.bf16 %v581_v40, %v580_v39  ;;  %v579_v43 = vmul.f32 0.05, %v575_v38  ;;  %v582_v44 = vmax.f32 %v574_v35, %v578_v41 }
 0x448   : > { %857 = vmatprep.mubr.msk.bf16.mxu0 %vm506_vm3, %v584_v42  ;;  %v583_v45 = vmax.f32 %v575_v38, %v579_v43 }
 0x44a   : > { %v585_v46 = vpack.c.bf16 %v583_v45, %v582_v44 }
 0x44c   : > { %858 = vmatmul.mubr.msk.bf16.vlgmr.msra.gmra.mrb[4].mxu0 %vm506_vm3, %v585_v46 }
 0x51f   : > { %v859_v49 = vpop.f32.mrb[4].mxu0 }
 0x520   : > { %v662_v50 = vpop.f32.mrb[5].mxu0  ;;  %v671_v52 = vadd.f32 %v859_v49, %v597_v48 }
 0x521   : > { %v860_v51 = vpop.f32.mrb[6].mxu0  ;;  %v663_v55 = vadd.f32 %v662_v50, %v597_v48 }
 0x522   : > { %v674_v53 = vadd.f32 %v860_v51, %v597_v48  ;;  %v665_v54 = vpop.f32.mrb[7].mxu0 }
 0x523   : > { %v666_v56 = vadd.f32 %v665_v54, %v597_v48 }
 0x524   : > { %v798_v57 = vpack.c.bf16 %v674_v53, %v671_v52 }
 0x525   : > { %v793_v58 = vpack.c.bf16 %v666_v56, %v663_v55 }
 0x526   : > { %800 = vst [vmem:[%s226_s10 + $0x8] sm:$0xff] %v798_v57  }
 0x527   : > { %794 = vst [vmem:[%s226_s10] sm:$0xff] %v793_v58  }
 0x528 PF: > { %s15_s18 = sadd.s32 1, %s906_s18  }
 0x529   : > { %p12_p4 = scmp.ge.s32.totalorder %s15_s18, 4  }
 0x52b   :  { %14 = sbr.rel (!%p12_p4) target bundleno = 1 (0x1), region = 70 }

</bundles_post_ra>
